<compile_context>
chip_gen: v7x
topology: tpu7x:2x2x1
jax: 0.10.0
libtpu: 0.0.40
codegen_flags: <defaults>
</compile_context>

<pallas_src>
import functools
import math

import jax
import jax.numpy as jnp
from jax.experimental import pallas as pl
from jax.experimental.pallas import tpu as pltpu


def _compute_padding_length(input_length, kernel_length, stride, dilation_rate=1):
    """Same logic as the torch reference (supports asymmetric padding)."""
    effective_k_size = (kernel_length - 1) * dilation_rate + 1
    if stride == 1:
        total_padding = effective_k_size - 1
    else:
        output_size = (input_length + stride - 1) // stride
        total_padding = max(0, (output_size - 1) * stride + effective_k_size - input_length)
    left_padding = total_padding // 2
    right_padding = total_padding - left_padding
    return (left_padding, right_padding)


def _conv2d_kernel(x_ref, w_ref, b_ref, o_ref, xp_ref, *, kh, oh, ph_lo, h):
    """'same' 2D conv (stride=1, dilation=1, groups=1) for one batch element.

    x_ref : (1, H, W*Cin)         unpadded input, W and Cin fused on lanes
    w_ref : (KH, W*Cin, OW*Cout)  banded weights (W taps + W 'same' pad folded in)
    b_ref : (1, OW*Cout)          bias tiled across OW (f32)
    o_ref : (1, OH, OW*Cout)      lane-dense output tile
    xp_ref: (Hp, W*Cin)           VMEM scratch holding the H-zero-padded input
    """
    # H zero-padding done in VMEM (no separate HBM pad op before the kernel).
    xp_ref[...] = jnp.zeros_like(xp_ref)
    xp_ref[ph_lo:ph_lo + h, :] = x_ref[0]

    # Bias folded into the accumulator init; accumulate in f32.
    acc = jnp.broadcast_to(b_ref[...], (oh, o_ref.shape[-1])).astype(jnp.float32)

    # KH lane-dense matmuls: (OH, W*Cin) x (W*Cin, OW*Cout).
    for i in range(kh):
        acc = acc + jnp.dot(
            xp_ref[i:i + oh, :], w_ref[i], preferred_element_type=jnp.float32
        )

    # Lane-dense store: last dim = OW*Cout (128 here) -> unmasked full-width vst.
    o_ref[0] = acc.astype(o_ref.dtype)


def _banded_weights(weight_hwio, W, OW, pw_lo):
    """Build (KH, W*Cin, OW*Cout) banded weights.

    band[i, u*Cin + c, w*Cout + o] = weight[i, u - w + pw_lo, c, o]
                                     if 0 <= u - w + pw_lo < KW else 0
    which folds both the W-direction taps and the W 'same' zero padding into
    a single dense (lane-wise) operand for the MXU.
    """
    KH, KW, Cin, Cout = weight_hwio.shape
    u = jnp.arange(W)
    w = jnp.arange(OW)
    j = u[:, None] - w[None, :] + pw_lo              # (W, OW) tap index along W
    valid = (j >= 0) & (j < KW)
    j_cl = jnp.clip(j, 0, KW - 1)
    band = weight_hwio[:, j_cl]                      # (KH, W, OW, Cin, Cout)
    band = jnp.where(valid[None, :, :, None, None], band, jnp.zeros((), band.dtype))
    band = jnp.transpose(band, (0, 1, 3, 2, 4))      # (KH, W, Cin, OW, Cout)
    return band.reshape(KH, W * Cin, OW * Cout)


def convnd_forward(x_nhwc, weight_hwio, bias, *, stride=(1, 1), dilation=(1, 1)):
    """Forward pass of ConvNd(..., padding='same', channel_last=True).

    x_nhwc:      (N, H, W, Cin)  channels_last input
    weight_hwio: (KH, KW, Cin, Cout)
    bias:        (Cout,)
    Returns:     (N, W_out, Cout, H_out)  -- faithful to the torch module.
    """
    # TODO(synk): only stride=1, dilation=1, groups=1 are implemented (matches
    # the module instantiation above).
    assert stride == (1, 1) and dilation == (1, 1)

    N, H, W, Cin = x_nhwc.shape
    KH, KW, Cin_w, Cout = weight_hwio.shape
    assert Cin == Cin_w

    ph = _compute_padding_length(H, KH, stride[0], dilation[0])
    pw = _compute_padding_length(W, KW, stride[1], dilation[1])
    Hp = H + ph[0] + ph[1]
    OH = Hp - KH + 1
    OW = (W + pw[0] + pw[1]) - KW + 1

    # Free row-major reshape: fuse W and Cin on the lane axis.
    x2 = x_nhwc.reshape(N, H, W * Cin)
    wband = _banded_weights(weight_hwio, W, OW, pw[0]).astype(x_nhwc.dtype)
    bias_tiled = jnp.tile(bias, OW).reshape(1, OW * Cout).astype(jnp.float32)

    kernel = functools.partial(_conv2d_kernel, kh=KH, oh=OH, ph_lo=ph[0], h=H)

    out = pl.pallas_call(
        kernel,
        out_shape=jax.ShapeDtypeStruct((N, OH, OW * Cout), x_nhwc.dtype),
        grid_spec=pltpu.PrefetchScalarGridSpec(
            num_scalar_prefetch=0,
            grid=(N,),
            in_specs=[
                pl.BlockSpec((1, H, W * Cin), lambda n: (n, 0, 0)),
                pl.BlockSpec((KH, W * Cin, OW * Cout), lambda n: (0, 0, 0)),
                pl.BlockSpec((1, OW * Cout), lambda n: (0, 0)),
            ],
            out_specs=pl.BlockSpec((1, OH, OW * Cout), lambda n: (n, 0, 0)),
            scratch_shapes=[pltpu.VMEM((Hp, W * Cin), x_nhwc.dtype)],
        ),
        compiler_params=pltpu.CompilerParams(
            dimension_semantics=("parallel",),
        ),
    )(x2, wband, bias_tiled)

    # (N, OH, OW*Cout) -> NHWC (free reshape), then the module's quirky second
    # channels_last->channels_first permute: NHWC -> (N, W_out, C_out, H_out).
    out = out.reshape(N, OH, OW, Cout)
    return jnp.transpose(out, (0, 2, 3, 1))


def _reference_forward(x_nhwc, weight_hwio, bias, *, stride=(1, 1), dilation=(1, 1)):
    """Pure-JAX reference with identical semantics (for correctness check)."""
    N, H, W, Cin = x_nhwc.shape
    KH, KW, _, Cout = weight_hwio.shape
    ph = _compute_padding_length(H, KH, stride[0], dilation[0])
    pw = _compute_padding_length(W, KW, stride[1], dilation[1])
    xp = jnp.pad(x_nhwc, ((0, 0), ph, pw, (0, 0)))
    y = jax.lax.conv_general_dilated(
        xp, weight_hwio,
        window_strides=stride, padding="VALID",
        rhs_dilation=dilation,
        dimension_numbers=("NHWC", "HWIO", "NHWC"),
    ) + bias[None, None, None, :]
    return jnp.transpose(y, (0, 2, 3, 1))


if __name__ == "__main__":
    key = jax.random.PRNGKey(0)
    k_x, k_w, k_b = jax.random.split(key, 3)

    # Module hyper-parameters.
    N, H, W = 2, 16, 16
    Cin, Cout = 4, 8
    KH, KW = 3, 3

    # Channels-last input, as the torch module (channel_last=True) expects.
    x = jax.random.normal(k_x, (N, H, W, Cin), dtype=jnp.float32)

    # Deterministic parameter init mimicking torch Conv2d default
    # (uniform in [-1/sqrt(fan_in), 1/sqrt(fan_in)]).
    fan_in = Cin * KH * KW
    bound = 1.0 / math.sqrt(fan_in)
    weight_hwio = jax.random.uniform(
        k_w, (KH, KW, Cin, Cout), dtype=jnp.float32, minval=-bound, maxval=bound)
    bias = jax.random.uniform(
        k_b, (Cout,), dtype=jnp.float32, minval=-bound, maxval=bound)

    conv_fn = jax.jit(convnd_forward)
    out = conv_fn(x, weight_hwio, bias)
    out = jax.block_until_ready(out)

    ref = _reference_forward(x, weight_hwio, bias)
    assert out.shape == (N, W, Cout, H), out.shape
    assert jnp.allclose(out, ref, atol=1e-5, rtol=1e-5), "mismatch vs reference"

    print("KERNEL_OK")
</pallas_src>

<mosaic_0001>
module attributes {stable_mosaic.version = 11 : i64} {
  func.func @_conv2d_kernel(%arg0: i32, %arg1: memref<1x16x64xf32, #tpu.memory_space<vmem>>, %arg2: memref<3x64x128xf32, #tpu.memory_space<vmem>>, %arg3: memref<1x128xf32, #tpu.memory_space<vmem>>, %arg4: memref<1x16x128xf32, #tpu.memory_space<vmem>>, %arg5: memref<18x64xf32, #tpu.memory_space<vmem>>) attributes {dimension_semantics = [#tpu.dimension_semantics<parallel>], iteration_bounds = array<i64: 2>, scalar_prefetch = 0 : i64, scratch_operands = 1 : i64, tpu.core_type = #tpu.core_type<tc>, window_params = [{transform_indices = @transform_0, window_bounds = array<i64: 1, 16, 64>}, {pipeline_mode = #tpu.pipeline_mode<synchronous>, transform_indices = @transform_1, window_bounds = array<i64: 3, 64, 128>}, {pipeline_mode = #tpu.pipeline_mode<synchronous>, transform_indices = @transform_2, window_bounds = array<i64: 1, 128>}, {transform_indices = @transform_3, window_bounds = array<i64: 1, 16, 128>}]} {
    %cst = arith.constant 0.000000e+00 : f32
    %0 = vector.broadcast %cst : f32 to vector<18x64xf32>
    %c0 = arith.constant 0 : index
    %c0_0 = arith.constant 0 : index
    %1 = vector.load %arg5[%c0, %c0_0] : memref<18x64xf32, #tpu.memory_space<vmem>>, vector<18x64xf32>
    tpu.vector_store %arg5[%c0, %c0_0], %0 {strides = array<i32>} : memref<18x64xf32, #tpu.memory_space<vmem>>, vector<18x64xf32>,
    %c0_1 = arith.constant 0 : index
    %c0_2 = arith.constant 0 : index
    %c0_3 = arith.constant 0 : index
    %2 = vector.load %arg1[%c0_1, %c0_2, %c0_3] : memref<1x16x64xf32, #tpu.memory_space<vmem>>, vector<1x16x64xf32>
    %3 = vector.shape_cast %2 : vector<1x16x64xf32> to vector<16x64xf32>
    %c1 = arith.constant 1 : index
    %c0_4 = arith.constant 0 : index
    %4 = vector.load %arg5[%c1, %c0_4] : memref<18x64xf32, #tpu.memory_space<vmem>>, vector<16x64xf32>
    tpu.vector_store %arg5[%c1, %c0_4], %3 {strides = array<i32>} : memref<18x64xf32, #tpu.memory_space<vmem>>, vector<16x64xf32>,
    %c0_5 = arith.constant 0 : index
    %c0_6 = arith.constant 0 : index
    %5 = vector.load %arg3[%c0_5, %c0_6] : memref<1x128xf32, #tpu.memory_space<vmem>>, vector<1x128xf32>
    %6 = vector.shape_cast %5 : vector<1x128xf32> to vector<1x128xf32>
    %7 = vector.broadcast %6 : vector<1x128xf32> to vector<16x128xf32>
    %c0_7 = arith.constant 0 : index
    %c0_8 = arith.constant 0 : index
    %8 = vector.load %arg5[%c0_7, %c0_8] : memref<18x64xf32, #tpu.memory_space<vmem>>, vector<16x64xf32>
    %c0_9 = arith.constant 0 : index
    %c0_10 = arith.constant 0 : index
    %c0_11 = arith.constant 0 : index
    %9 = vector.load %arg2[%c0_9, %c0_10, %c0_11] : memref<3x64x128xf32, #tpu.memory_space<vmem>>, vector<1x64x128xf32>
    %10 = vector.shape_cast %9 : vector<1x64x128xf32> to vector<64x128xf32>
    %cst_12 = arith.constant dense<0.000000e+00> : vector<16x128xf32>
    %11 = tpu.matmul %8, %10, %cst_12 {dimension_numbers = #tpu.dot_dimension_numbers<[1], [0], [0], [1], [0, 0, 1, 1], [], []>} : vector<16x64xf32>, vector<64x128xf32>, vector<16x128xf32> -> vector<16x128xf32>
    %12 = arith.addf %7, %11 : vector<16x128xf32>
    %c1_13 = arith.constant 1 : index
    %c0_14 = arith.constant 0 : index
    %13 = vector.load %arg5[%c1_13, %c0_14] : memref<18x64xf32, #tpu.memory_space<vmem>>, vector<16x64xf32>
    %c1_15 = arith.constant 1 : index
    %c0_16 = arith.constant 0 : index
    %c0_17 = arith.constant 0 : index
    %14 = vector.load %arg2[%c1_15, %c0_16, %c0_17] : memref<3x64x128xf32, #tpu.memory_space<vmem>>, vector<1x64x128xf32>
    %15 = vector.shape_cast %14 : vector<1x64x128xf32> to vector<64x128xf32>
    %cst_18 = arith.constant dense<0.000000e+00> : vector<16x128xf32>
    %16 = tpu.matmul %13, %15, %cst_18 {dimension_numbers = #tpu.dot_dimension_numbers<[1], [0], [0], [1], [0, 0, 1, 1], [], []>} : vector<16x64xf32>, vector<64x128xf32>, vector<16x128xf32> -> vector<16x128xf32>
    %17 = arith.addf %12, %16 : vector<16x128xf32>
    %c2 = arith.constant 2 : index
    %c0_19 = arith.constant 0 : index
    %18 = vector.load %arg5[%c2, %c0_19] : memref<18x64xf32, #tpu.memory_space<vmem>>, vector<16x64xf32>
    %c2_20 = arith.constant 2 : index
    %c0_21 = arith.constant 0 : index
    %c0_22 = arith.constant 0 : index
    %19 = vector.load %arg2[%c2_20, %c0_21, %c0_22] : memref<3x64x128xf32, #tpu.memory_space<vmem>>, vector<1x64x128xf32>
    %20 = vector.shape_cast %19 : vector<1x64x128xf32> to vector<64x128xf32>
    %cst_23 = arith.constant dense<0.000000e+00> : vector<16x128xf32>
    %21 = tpu.matmul %18, %20, %cst_23 {dimension_numbers = #tpu.dot_dimension_numbers<[1], [0], [0], [1], [0, 0, 1, 1], [], []>} : vector<16x64xf32>, vector<64x128xf32>, vector<16x128xf32> -> vector<16x128xf32>
    %22 = arith.addf %17, %21 : vector<16x128xf32>
    %c0_24 = arith.constant 0 : index
    %c0_25 = arith.constant 0 : index
    %c0_26 = arith.constant 0 : index
    %23 = vector.load %arg4[%c0_24, %c0_25, %c0_26] : memref<1x16x128xf32, #tpu.memory_space<vmem>>, vector<1x16x128xf32>
    %24 = vector.shape_cast %23 : vector<1x16x128xf32> to vector<16x128xf32>
    %25 = vector.shape_cast %22 : vector<16x128xf32> to vector<1x16x128xf32>
    tpu.vector_store %arg4[%c0_24, %c0_25, %c0_26], %25 {strides = array<i32>} : memref<1x16x128xf32, #tpu.memory_space<vmem>>, vector<1x16x128xf32>,
    return
  }
  func.func @transform_0(%arg0: i32) -> (i32, i32, i32) {
    %c0_i32 = arith.constant 0 : i32
    %c0_i32_0 = arith.constant 0 : i32
    %c0_i32_1 = arith.constant 0 : i32
    return %arg0, %c0_i32, %c0_i32_0 : i32, i32, i32
  }
  func.func @transform_1(%arg0: i32) -> (i32, i32, i32) {
    %c0_i32 = arith.constant 0 : i32
    %c0_i32_0 = arith.constant 0 : i32
    %c0_i32_1 = arith.constant 0 : i32
    %c0_i32_2 = arith.constant 0 : i32
    return %c0_i32, %c0_i32_0, %c0_i32_1 : i32, i32, i32
  }
  func.func @transform_2(%arg0: i32) -> (i32, i32) {
    %c0_i32 = arith.constant 0 : i32
    %c0_i32_0 = arith.constant 0 : i32
    %c0_i32_1 = arith.constant 0 : i32
    return %c0_i32, %c0_i32_0 : i32, i32
  }
  func.func @transform_3(%arg0: i32) -> (i32, i32, i32) {
    %c0_i32 = arith.constant 0 : i32
    %c0_i32_0 = arith.constant 0 : i32
    %c0_i32_1 = arith.constant 0 : i32
    return %arg0, %c0_i32, %c0_i32_0 : i32, i32, i32
  }
}

</mosaic_0001>

<bundles_post_ra>
// kernel: tile.8
= control target key start
LH: loop header
LB: loop body
LE: loop exit
PB: predicated region body
PF: predicated region fallthrough
CT: control target
= control target key end

     0   :  { %s28_s0 = inlined_call_operand.vmem [shape: f32[8], index: 0, kind: input, shape index: {}]   ;;  %s29_s1 = inlined_call_operand.vmem [shape: f32[16,8], index: 1, kind: output, shape index: {}]  }
   0x1   :  { %v4_v0 = vld [vmem:[%s28_s0] ss:$0 sm:$0xff] }
   0x2   :  { %5 = vst [vmem:[%s29_s1] sm:$0xff] %v4_v0  ;;  %8 = vst [vmem:[%s29_s1 + $0x8] sm:$0xff] %v4_v0 }

// kernel: tile.9
= control target key start
LH: loop header
LB: loop body
LE: loop exit
PB: predicated region body
PF: predicated region fallthrough
CT: control target
= control target key end

     0   :  { %s131_s10 = smov 120   ;;  %s132_s11 = smov 104   ;;  %vm3_vm0 = vcmask 64512   ;;  %vm9_vm1 = vcmask 1048512   ;;  %vm15_vm2 = vcmask 982912   ;;  %vm21_vm3 = vcmask 917312   ;;  %s207_s0 = inlined_call_operand.vmem [shape: f32[16,8], index: 0, kind: input, shape index: {}]   ;;  %s208_s1 = inlined_call_operand.vmem [shape: f32[1,128], index: 1, kind: output, shape index: {}]  }
   0x1   :  { %v101_v0 = vld [vmem:[%s207_s0 + $0xf] sm:$0x1]   ;;  %v103_v1 = vld [vmem:[%s207_s0 + $0xd] sm:$0x1]   ;;  %v102_v2 = vld [vmem:[%s207_s0 + $0xe] sm:$0x1]  }
   0x2   :  { %7 = vrot.lane.b32.xlu0 %v101_v0, %s131_s10  ;;  %19 = vrot.lane.b32.xlu1 %v103_v1, %s132_s11  ;;  %v104_v3 = vld [vmem:[%s207_s0 + $0xc] sm:$0x1]   ;;  %s133_s16 = smov 112   ;;  %s134_s17 = smov 96   ;;  %v105_v4 = vld [vmem:[%s207_s0 + $0xb] sm:$0x1]  }
   0x3   :  { %v106_v5 = vld [vmem:[%s207_s0 + $0xa] sm:$0x1]   ;;  %v2_v6 = vld [vmem:[%s207_s0] sm:$0x1]   ;;  %s135_s24 = smov 88   ;;  %s136_s25 = smov 80  }
   0x4   :  { %4 = vst.msk [vmem:[#allocation0] sm:$0x1] %vm3_vm0, %v2_v6   ;;  %v107_v7 = vld [vmem:[%s207_s0 + $0x9] sm:$0x1]   ;;  %v108_v8 = vld [vmem:[%s207_s0 + $0x8] sm:$0x1]  }
   0x5   :  { %s137_s30 = smov 72   ;;  %s138_s2 = smov 64   ;;  %v109_v9 = vld [vmem:[%s207_s0 + $0x7] sm:$0x1]   ;;  %v110_v10 = vld [vmem:[%s207_s0 + $0x6] sm:$0x1]  }
   0x6   :  { %13 = vrot.lane.b32.xlu0 %v102_v2, %s133_s16  ;;  %25 = vrot.lane.b32.xlu1 %v104_v3, %s134_s17  ;;  %s139_s7 = smov 56   ;;  %s140_s8 = smov 48   ;;  %v111_v11 = vld [vmem:[%s207_s0 + $0x5] sm:$0x1]   ;;  %v112_v12 = vld [vmem:[%s207_s0 + $0x4] sm:$0x1]  }
   0x7   :  { %s141_s13 = smov 40   ;;  %s142_s14 = smov 32   ;;  %v113_v13 = vld [vmem:[%s207_s0 + $0x3] sm:$0x1]   ;;  %v114_v14 = vld [vmem:[%s207_s0 + $0x2] sm:$0x1]  }
   0x8   :  { %s143_s19 = smov 24   ;;  %s144_s20 = smov 16   ;;  %v115_v15 = vld [vmem:[%s207_s0 + $0x1] sm:$0x1]   ;;  %vm27_vm4 = vcmask 851712   ;;  %vm33_vm5 = vcmask 786112  }
   0x9   :  { %s145_s0 = smov 8   ;;  %vm39_vm6 = vcmask 720512   ;;  %vm45_vm7 = vcmask 654912   ;;  %vm51_vm8 = vcmask 589312   ;;  %vm57_vm9 = vcmask 523712  }
   0xa   :  { %31 = vrot.lane.b32.xlu0 %v105_v4, %s135_s24  ;;  %37 = vrot.lane.b32.xlu1 %v106_v5, %s136_s25  ;;  %vm63_vm10 = vcmask 458112   ;;  %vm69_vm11 = vcmask 392512   ;;  %vm75_vm12 = vcmask 326912   ;;  %vm81_vm13 = vcmask 261312  }
   0xb   :  { %vm87_vm14 = vcmask 195712   ;;  %vm93_vm15 = vcmask 130112  }
   0xe   :  { %43 = vrot.lane.b32.xlu0 %v107_v7, %s137_s30  ;;  %49 = vrot.lane.b32.xlu1 %v108_v8, %s138_s2 }
  0x12   :  { %55 = vrot.lane.b32.xlu0 %v109_v9, %s139_s7  ;;  %61 = vrot.lane.b32.xlu1 %v110_v10, %s140_s8 }
  0x16   :  { %67 = vrot.lane.b32.xlu0 %v111_v11, %s141_s13  ;;  %73 = vrot.lane.b32.xlu1 %v112_v12, %s142_s14 }
  0x1a   :  { %79 = vrot.lane.b32.xlu0 %v113_v13, %s143_s19  ;;  %85 = vrot.lane.b32.xlu1 %v114_v14, %s144_s20 }
  0x1e   :  { %91 = vrot.lane.b32.xlu0 %v115_v15, %s145_s0 }
  0x74   :  { %v8_v16 = vpop.permute.xlu0 %7   ;;  %v20_v17 = vpop.permute.xlu1 %19  }
  0x75   :  { %10 = vst.msk [vmem:[#allocation0] sm:$0x1] %vm9_vm1, %v8_v16  }
  0x78   :  { %v14_v18 = vpop.permute.xlu0 %13   ;;  %v26_v19 = vpop.permute.xlu1 %25  }
  0x79   :  { %16 = vst.msk [vmem:[#allocation0] sm:$0x1] %vm15_vm2, %v14_v18  }
  0x7a   :  { %22 = vst.msk [vmem:[#allocation0] sm:$0x1] %vm21_vm3, %v20_v17  }
  0x7b   :  { %28 = vst.msk [vmem:[#allocation0] sm:$0x1] %vm27_vm4, %v26_v19  }
  0x7c   :  { %v32_v20 = vpop.permute.xlu0 %31   ;;  %v38_v21 = vpop.permute.xlu1 %37  }
  0x7d   :  { %34 = vst.msk [vmem:[#allocation0] sm:$0x1] %vm33_vm5, %v32_v20  }
  0x7e   :  { %40 = vst.msk [vmem:[#allocation0] sm:$0x1] %vm39_vm6, %v38_v21  }
  0x80   :  { %v44_v22 = vpop.permute.xlu0 %43   ;;  %v50_v23 = vpop.permute.xlu1 %49  }
  0x81   :  { %46 = vst.msk [vmem:[#allocation0] sm:$0x1] %vm45_vm7, %v44_v22  }
  0x82   :  { %52 = vst.msk [vmem:[#allocation0] sm:$0x1] %vm51_vm8, %v50_v23  }
  0x84   :  { %v56_v24 = vpop.permute.xlu0 %55   ;;  %v62_v25 = vpop.permute.xlu1 %61  }
  0x85   :  { %58 = vst.msk [vmem:[#allocation0] sm:$0x1] %vm57_vm9, %v56_v24  }
  0x86   :  { %64 = vst.msk [vmem:[#allocation0] sm:$0x1] %vm63_vm10, %v62_v25  }
  0x88   :  { %v68_v26 = vpop.permute.xlu0 %67   ;;  %v74_v27 = vpop.permute.xlu1 %73  }
  0x89   :  { %70 = vst.msk [vmem:[#allocation0] sm:$0x1] %vm69_vm11, %v68_v26  }
  0x8a   :  { %76 = vst.msk [vmem:[#allocation0] sm:$0x1] %vm75_vm12, %v74_v27  }
  0x8c   :  { %v80_v28 = vpop.permute.xlu0 %79   ;;  %v86_v29 = vpop.permute.xlu1 %85  }
  0x8d   :  { %82 = vst.msk [vmem:[#allocation0] sm:$0x1] %vm81_vm13, %v80_v28  }
  0x8e   :  { %88 = vst.msk [vmem:[#allocation0] sm:$0x1] %vm87_vm14, %v86_v29  }
  0x90   :  { %v92_v30 = vpop.permute.xlu0 %91  }
  0x91   :  { %94 = vst.msk [vmem:[#allocation0] sm:$0x1] %vm93_vm15, %v92_v30  }
  0x98   :  { %v98_v31 = vld [vmem:[#allocation0] sm:$0x1] }
  0x99   :  { %100 = vst [vmem:[%s208_s1] sm:$0x1] %v98_v31 }

// kernel: convnd_forward.1
= control target key start
LH: loop header
LB: loop body
LE: loop exit
PB: predicated region body
PF: predicated region fallthrough
CT: control target
= control target key end

     0   :  { %s740_s12 = smov 0   ;;  %s849_s0 = inlined_call_operand.vmem [shape: f32[2,16,64], index: 0, kind: input, shape index: {}]   ;;  %s850_s1 = inlined_call_operand.vmem [shape: f32[3,64,128], index: 1, kind: input, shape index: {}]   ;;  %s851_s2 = inlined_call_operand.vmem [shape: f32[1,128], index: 2, kind: input, shape index: {}]   ;;  %s852_s3 = inlined_call_operand.vmem [shape: f32[2,16,128], index: 3, kind: output, shape index: {}]  }
   0x1 LB: > { %s525_s13 = sadd.s32 4294967295, %s717_s12   ;;  %p529_p0 = scmp.ge.s32.totalorder %s717_s12, 1  ;;  %s717_s12 = sphi %s740_s12, %s13_s12  }
   0x2   : > { %p137_p1 = scmp.lt.s32.totalorder %s717_s12, 3 }
   0x4   : > { %p138_p2 = pnand %p529_p0, %p137_p1 }
   0x5   : > { %v537_v0 = vld [vmem:[%s850_s1 + $0x40] sm:$0xff] (!%p138_p2)  ;;  %v538_v1 = vld [vmem:[%s850_s1 + $0x48] sm:$0xff] (!%p138_p2)  ;;  %v539_v2 = vld [vmem:[%s850_s1 + $0x50] sm:$0xff] (!%p138_p2)  ;;  %p161_p3 = scmp.lt.s32.totalorder (!%p138_p2), %s525_s13, 1  ;;  %vm171_vm0 = vcmask (!%p138_p2), 523264   ;;  %v719_v5 = vmov (!%p138_p2), 0.0  }
   0x6   : > { %141 = sbr.rel (%p138_p2) target bundleno = 258 (0x102), region = 32  ;;  %v664_v3 = vpack.c.bf16 (!%p138_p2), %v538_v1, %v537_v0  ;;  %v540_v4 = vld [vmem:[%s850_s1 + $0x58] sm:$0xff] (!%p138_p2)  ;;  %172 = vst.msk [vmem:[#allocation2] sm:$0xff] (!%p138_p2), %vm171_vm0, %v719_v5  ;;  %173 = vst.msk [vmem:[#allocation2 + $0x8] sm:$0xff] (!%p138_p2), %vm171_vm0, %v719_v5  ;;  %vm174_vm1 = vcmask (!%p138_p2), 517120   ;;  %v541_v7 = vld [vmem:[%s850_s1 + $0x60] sm:$0xff] (!%p138_p2) }
   0x7   : > { %v668_v6 = vpack.c.bf16 (!%p138_p2), %v540_v4, %v539_v2  ;;  %v542_v8 = vld [vmem:[%s850_s1 + $0x68] sm:$0xff] (!%p138_p2)  ;;  %v189_v9 = vld [vmem:[%s850_s1] sm:$0xff] (!%p138_p2)  ;;  %175 = vst.msk [vmem:[#allocation2 + $0x10] sm:$0x3] (!%p138_p2), %vm174_vm1, %v719_v5  ;;  %v191_v12 = vld [vmem:[%s850_s1 + $0x10] sm:$0xff] (!%p138_p2) }
   0x8   : > { %665 = vmatprep.subr.bf16.mxu0 (!%p138_p2), %v664_v3  ;;  %v190_v10 = vld [vmem:[%s850_s1 + $0x8] sm:$0xff] (!%p138_p2)  ;;  %v192_v13 = vld [vmem:[%s850_s1 + $0x18] sm:$0xff] (!%p138_p2)  ;;  %v672_v14 = vpack.c.bf16 (!%p138_p2), %v542_v8, %v541_v7  ;;  %v543_v15 = vld [vmem:[%s850_s1 + $0x70] sm:$0xff] (!%p138_p2) }
   0x9   : > { %667 = vmatpush3.bf16.msra.mxu0 (!%p138_p2), %v664_v3  ;;  %v648_v11 = vpack.c.bf16 (!%p138_p2), %v190_v10, %v189_v9  ;;  %v652_v16 = vpack.c.bf16 (!%p138_p2), %v192_v13, %v191_v12  ;;  %v193_v17 = vld [vmem:[%s850_s1 + $0x20] sm:$0xff] (!%p138_p2)  ;;  %v194_v18 = vld [vmem:[%s850_s1 + $0x28] sm:$0xff] (!%p138_p2)  ;;  %v544_v19 = vld [vmem:[%s850_s1 + $0x78] sm:$0xff] (!%p138_p2) }
   0xa   : > { %669 = vmatprep.subr.bf16.mxu0 (!%p138_p2), %v668_v6  ;;  %v656_v22 = vpack.c.bf16 (!%p138_p2), %v194_v18, %v193_v17  ;;  %v676_v23 = vpack.c.bf16 (!%p138_p2), %v544_v19, %v543_v15  ;;  %v195_v24 = vld [vmem:[%s850_s1 + $0x30] sm:$0xff] (!%p138_p2)  ;;  %v196_v25 = vld [vmem:[%s850_s1 + $0x38] sm:$0xff] (!%p138_p2)  ;;  %v547_v26 = vld [vmem:[%s850_s1 + $0x80] sm:$0xff] (!%p138_p2) }
   0xb   : > { %649 = vmatprep.subr.bf16.mxu1 (!%p138_p2), %v648_v11  ;;  %v548_v27 = vld [vmem:[%s850_s1 + $0x88] sm:$0xff] (!%p138_p2)  ;;  %v660_v28 = vpack.c.bf16 (!%p138_p2), %v196_v25, %v195_v24  ;;  %v549_v30 = vld [vmem:[%s850_s1 + $0x90] sm:$0xff] (!%p138_p2)  ;;  %v550_v32 = vld [vmem:[%s850_s1 + $0x98] sm:$0xff] (!%p138_p2) }
   0xc   : > { %651 = vmatpush3.bf16.msra.mxu1 (!%p138_p2), %v648_v11  ;;  %v680_v29 = vpack.c.bf16 (!%p138_p2), %v548_v27, %v547_v26  ;;  %v684_v35 = vpack.c.bf16 (!%p138_p2), %v550_v32, %v549_v30  ;;  %v551_v37 = vld [vmem:[%s850_s1 + $0xa0] sm:$0xff] (!%p138_p2)  ;;  %v552_v38 = vld [vmem:[%s850_s1 + $0xa8] sm:$0xff] (!%p138_p2)  ;;  %v553_v41 = vld [vmem:[%s850_s1 + $0xb0] sm:$0xff] (!%p138_p2) }
   0xd   : > { %s854_s13 = smov (!%p161_p3, %s525_s13), 1  ;;  %671 = vmatpush3.bf16.msra.mxu0 %v668_v6  ;;  %653 = vmatprep.subr.bf16.mxu1 %v652_v16  ;;  %v688_v40 = vpack.c.bf16 %v552_v38, %v551_v37  ;;  %v554_v42 = vld [vmem:[%s850_s1 + $0xb8] sm:$0xff]  ;;  %v534_v47 = vld [vmem:[%s851_s2] ss:$0 sm:$0xff] }
   0xe   : > { %s559_s30 = sshll.u32 %s854_s13, 4  ;;  %673 = vmatprep.subr.bf16.mxu0 %v672_v14  ;;  %v692_v43 = vpack.c.bf16 %v554_v42, %v553_v41 }
   0xf   : > { %s165_s14 = scalar_lea.vmem %s849_s0, %s559_s30  ;;  %s170_s21 = scalar_lea.vmem %s852_s3, %s559_s30 }
  0x10   : > { %v176_v20 = vld [vmem:[%s165_s14] sm:$0xff]  ;;  %v177_v21 = vld [vmem:[%s165_s14 + $0x8] sm:$0xff]  ;;  %655 = vmatpush3.bf16.msra.mxu1 %v652_v16 }
  0x11   : > { %178 = vst.msk [vmem:[#allocation2 + $0x1] sm:$0xff] %vm171_vm0, %v176_v20  ;;  %179 = vst.msk [vmem:[#allocation2 + $0x9] sm:$0xff] %vm171_vm0, %v177_v21  ;;  %675 = vmatpush3.bf16.msra.mxu0 %v672_v14  ;;  %657 = vmatprep.subr.bf16.mxu1 %v656_v22 }
  0x12   : > { %677 = vmatprep.subr.bf16.mxu0 %v676_v23 }
  0x14   : > { %659 = vmatpush3.bf16.msra.mxu1 %v656_v22 }
  0x15   : > { %679 = vmatpush3.bf16.msra.mxu0 %v676_v23  ;;  %661 = vmatprep.subr.bf16.mxu1 %v660_v28 }
  0x16   : > { %681 = vmatprep.subr.bf16.mxu0 %v680_v29 }
  0x18   : > { %v280_v31 = vld [vmem:[#allocation2 + $0x1] sm:$0xff]  ;;  %v281_v34 = vld [vmem:[#allocation2 + $0x9] sm:$0xff]  ;;  %663 = vmatpush3.bf16.msra.mxu1 %v660_v28 }
  0x19   : > { %v187_v33 = vld [vmem:[#allocation2] sm:$0xff]  ;;  %626 = vmatprep.mubr.msk.f32.mxu0 %vm171_vm0, %v280_v31  ;;  %v188_v39 = vld [vmem:[#allocation2 + $0x8] sm:$0xff] }
  0x1a   : > { %607 = vmatprep.mubr.msk.f32.mxu1 %vm171_vm0, %v187_v33  ;;  %v374_v36 = vld [vmem:[#allocation2 + $0x2] sm:$0xff]  ;;  %627 = vmatmul.mubr.msk.f32.vlgmr.msra.gmra.mrb[0].mxu0 %vm171_vm0, %v281_v34  ;;  %v375_v44 = vld [vmem:[#allocation2 + $0xa] sm:$0xff] }
  0x1b   : > { %683 = vmatpush3.bf16.msra.mxu0 %v680_v29  ;;  %645 = vmatprep.mubr.msk.f32.mxu0 %vm171_vm0, %v374_v36 }
  0x1c   : > { %685 = vmatprep.subr.bf16.mxu0 %v684_v35  ;;  %608 = vmatmul.mubr.msk.f32.vlgmr.msra.gmra.mrb[0].mxu1 %vm171_vm0, %v188_v39 }
  0x1f   : > { %687 = vmatpush3.bf16.msra.mxu0 %v684_v35 }
  0x20   : > { %689 = vmatprep.subr.bf16.mxu0 %v688_v40 }
  0x23   : > { %691 = vmatpush3.bf16.msra.mxu0 %v688_v40 }
  0x24   : > { %693 = vmatprep.subr.bf16.mxu0 %v692_v43 }
  0x27   : > { %695 = vmatpush3.bf16.msra.mxu0 %v692_v43 }
  0x2a   : > { %646 = vmatmul.mubr.msk.f32.vlgmr.msra.gmra.mrb[0].mxu0 %vm171_vm0, %v375_v44 }
  0xef   : > { %v609_v45 = vpop.f32.mrb[0].mxu1 }
  0xf0   : > { %v269_v46 = vpop.f32.mrb[1].mxu1  ;;  %v279_v48 = vadd.f32 %v609_v45, %v534_v47 }
  0xf1   : > { %v278_v49 = vadd.f32 %v534_v47, %v269_v46 }
  0xfd   : > { %v647_v50 = vpop.f32.mrb[0].mxu0 }
  0xfe   : > { %v697_v51 = vadd.f32 %v647_v50, %v279_v48  ;;  %v457_v52 = vpop.f32.mrb[1].mxu0 }
  0xff   : > { %v699_v53 = vadd.f32 %v457_v52, %v278_v49 }
 0x100   : > { %469 = vst [vmem:[%s170_s21 + $0x8] sm:$0xff] %v697_v51 }
 0x101   : > { %468 = vst [vmem:[%s170_s21] sm:$0xff] %v699_v53 }
 0x102 PF: > { %s13_s12 = sadd.s32 1, %s717_s12  }
 0x103   : > { %p10_p4 = scmp.ge.s32.totalorder %s13_s12, 4  }
 0x105   :  { %12 = sbr.rel (!%p10_p4) target bundleno = 1 (0x1), region = 64 }

</bundles_post_ra>
